<compile_context>
chip_gen: v6e
topology: v6e:2x2x1
jax: 0.10.0
libtpu: 0.0.40
codegen_flags: <defaults>
</compile_context>

<pallas_src>
import jax
import jax.numpy as jnp
from jax.experimental import pallas as pl
from jax.experimental.pallas import tpu as pltpu


def _round_up(v, m):
    return (v + m - 1) // m * m


def _linear_kernel_f32out(x_ref, w_ref, b_ref, o_ref):
    """f32 output: accumulate directly into the resident output block."""
    # x_ref: (tm, tk)  w_ref: (tk, tn)  b_ref: (1, tn)  o_ref: (tm, tn) f32
    k = pl.program_id(2)

    @pl.when(k == 0)
    def _():
        o_ref[...] = jnp.broadcast_to(b_ref[...], o_ref.shape)

    # Native (M,K)x(K,N) MXU contraction, f32 accumulation.
    o_ref[...] += jnp.dot(x_ref[...], w_ref[...],
                          preferred_element_type=jnp.float32)


def _linear_kernel_lowp(x_ref, w_ref, b_ref, o_ref, acc_ref):
    """Low-precision output: f32 VMEM accumulator, cast+store on last k step."""
    k = pl.program_id(2)

    @pl.when(k == 0)
    def _():
        acc_ref[...] = jnp.broadcast_to(
            b_ref[...].astype(jnp.float32), acc_ref.shape)

    acc_ref[...] += jnp.dot(x_ref[...], w_ref[...],
                            preferred_element_type=jnp.float32)

    @pl.when(k == pl.num_programs(2) - 1)
    def _():
        o_ref[...] = acc_ref[...].astype(o_ref.dtype)


def linear_regression_forward(x, weight, bias, *, tm=1024, tn=512, tk=1024,
                              compute_dtype=None):
    """Pallas equivalent of torch.nn.Linear(n_feature, n_label)(x).

    x:      [B, F]
    weight: [L, F]   (PyTorch Linear convention)
    bias:   [L]
    returns [B, L]
    """
    B, F = x.shape
    L, F2 = weight.shape
    assert F == F2

    # Optional wrapper-side low-precision cast (halves HBM bytes for x / W,
    # bf16 MXU rate on v6e/v7x); accumulation stays f32 in the kernel.
    if compute_dtype is not None:
        x = x.astype(compute_dtype)
        weight = weight.astype(compute_dtype)

    op_dtype = x.dtype
    out_dtype = op_dtype
    itemsize = jnp.dtype(op_dtype).itemsize
    sublane = 8 * max(1, 4 // itemsize)  # 8 f32, 16 bf16, 32 int8/fp8

    # Clamp tile targets to the (sublane/lane aligned) problem size.
    tm = min(tm, _round_up(B, sublane))
    tn = min(tn, _round_up(L, 128))
    tk = min(tk, _round_up(F, 128))

    # Padding:
    #   B -> sublane multiple only (cheap; never a full tm-multiple pad of x).
    #   L -> lane multiple only (lane-dense stores; edge blocks via cdiv grid).
    #   F -> full tk multiple with zeros (required: contraction correctness).
    B_pad = _round_up(B, sublane)
    L_pad = _round_up(L, 128)
    F_pad = _round_up(F, tk)

    w_t = weight.T  # (F, L): native (K, N) layout for the MXU, paid once.
    x_p = x if (B_pad == B and F_pad == F) else jnp.pad(
        x, ((0, B_pad - B), (0, F_pad - F)))
    w_p = w_t if (F_pad == F and L_pad == L) else jnp.pad(
        w_t, ((0, F_pad - F), (0, L_pad - L)))
    b_p = (bias if L_pad == L else jnp.pad(bias, (0, L_pad - L))).reshape(1, L_pad)

    gi = pl.cdiv(B_pad, tm)   # batch blocks
    gj = pl.cdiv(L_pad, tn)   # label blocks
    gk = F_pad // tk          # reduction blocks (exact by construction)

    # Put the parallel axis with the most blocks first (megacore sharding on
    # v7x shards the leading parallel dim); keep the reduction axis last.
    if gj > gi:
        grid = (gj, gi, gk)
        x_map = lambda j, i, k: (i, k)
        w_map = lambda j, i, k: (k, j)
        b_map = lambda j, i, k: (0, j)
        o_map = lambda j, i, k: (i, j)
    else:
        grid = (gi, gj, gk)
        x_map = lambda i, j, k: (i, k)
        w_map = lambda i, j, k: (k, j)
        b_map = lambda i, j, k: (0, j)
        o_map = lambda i, j, k: (i, j)

    if out_dtype == jnp.float32:
        kernel = _linear_kernel_f32out
        scratch = []
    else:
        kernel = _linear_kernel_lowp
        scratch = [pltpu.VMEM((tm, tn), jnp.float32)]

    # Advisory cost estimate including tile re-reads (x re-read per label
    # block, W re-read per batch block) and the resident bias.
    cost = pl.CostEstimate(
        flops=2 * B_pad * L_pad * F_pad,
        transcendentals=0,
        bytes_accessed=(
            itemsize * (B_pad * F_pad * gj + F_pad * L_pad * gi)
            + jnp.dtype(out_dtype).itemsize * B_pad * L_pad
            + jnp.dtype(b_p.dtype).itemsize * L_pad * gi
        ),
    )

    out = pl.pallas_call(
        kernel,
        out_shape=jax.ShapeDtypeStruct((B_pad, L_pad), out_dtype),
        grid_spec=pltpu.PrefetchScalarGridSpec(
            num_scalar_prefetch=0,
            grid=grid,
            in_specs=[
                pl.BlockSpec((tm, tk), x_map),   # x tile (M, K)
                pl.BlockSpec((tk, tn), w_map),   # W^T tile (K, N), native layout
                pl.BlockSpec((1, tn), b_map),    # bias tile, resident over k
            ],
            out_specs=pl.BlockSpec((tm, tn), o_map),
            scratch_shapes=scratch,
        ),
        compiler_params=pltpu.CompilerParams(
            dimension_semantics=("parallel", "parallel", "arbitrary"),
            vmem_limit_bytes=48 << 20,  # safe on v5e/v6e (128 MiB) and v7x (64 MiB)
        ),
        cost_estimate=cost,
    )(x_p, w_p, b_p)

    if B_pad != B or L_pad != L:
        out = out[:B, :L]
    return out


def _check(key, batch, n_feature, n_label, atol=1e-4):
    kx, kw, kb = jax.random.split(key, 3)
    bound = 1.0 / jnp.sqrt(jnp.float32(n_feature))
    weight = jax.random.uniform(kw, (n_label, n_feature), jnp.float32, -bound, bound)
    bias = jax.random.uniform(kb, (n_label,), jnp.float32, -bound, bound)
    x = jax.random.normal(kx, (batch, n_feature), jnp.float32)

    out = jax.block_until_ready(linear_regression_forward(x, weight, bias))
    ref = x @ weight.T + bias
    assert out.shape == (batch, n_label)
    assert jnp.allclose(out, ref, atol=atol, rtol=1e-5), (
        float(jnp.max(jnp.abs(out - ref))))
    return out


if __name__ == "__main__":
    key = jax.random.PRNGKey(0)
    k0, k1, k2 = jax.random.split(key, 3)

    # Primary (module-sized) check: batch=2, n_feature=32, n_label=8.
    _check(k0, batch=2, n_feature=32, n_label=8)

    # Multi-k-step accumulation + non-aligned batch/label padding path.
    _check(k1, batch=300, n_feature=1536, n_label=200)

    # Wide-label path: exercises the grid re-ordering and a partial edge block.
    _check(k2, batch=16, n_feature=384, n_label=1200)

    print("KERNEL_OK")
</pallas_src>

<mosaic_0001>
module attributes {stable_mosaic.version = 11 : i64} {
  func.func @_linear_kernel_f32out(%arg0: i32, %arg1: i32, %arg2: i32, %arg3: memref<8x128xf32, #tpu.memory_space<vmem>>, %arg4: memref<128x128xf32, #tpu.memory_space<vmem>>, %arg5: memref<1x128xf32, #tpu.memory_space<vmem>>, %arg6: memref<8x128xf32, #tpu.memory_space<vmem>>) attributes {dimension_semantics = [#tpu.dimension_semantics<parallel>, #tpu.dimension_semantics<parallel>, #tpu.dimension_semantics<arbitrary>], iteration_bounds = array<i64: 1, 1, 1>, scalar_prefetch = 0 : i64, scratch_operands = 0 : i64, tpu.core_type = #tpu.core_type<tc>, window_params = [{transform_indices = @transform_0, window_bounds = array<i64: 8, 128>}, {transform_indices = @transform_1, window_bounds = array<i64: 128, 128>}, {transform_indices = @transform_2, window_bounds = array<i64: 1, 128>}, {transform_indices = @transform_3, window_bounds = array<i64: 8, 128>}]} {
    %c0_i32 = arith.constant 0 : i32
    %0 = arith.cmpi eq, %arg2, %c0_i32 : i32
    %1 = arith.extui %0 : i1 to i32
    %c0_i32_0 = arith.constant 0 : i32
    %2 = arith.cmpi ne, %1, %c0_i32_0 : i32
    scf.if %2 {
      %c0_8 = arith.constant 0 : index
      %c0_9 = arith.constant 0 : index
      %9 = vector.load %arg5[%c0_8, %c0_9] : memref<1x128xf32, #tpu.memory_space<vmem>>, vector<1x128xf32>
      %10 = vector.shape_cast %9 : vector<1x128xf32> to vector<1x128xf32>
      %11 = vector.broadcast %10 : vector<1x128xf32> to vector<8x128xf32>
      %c0_10 = arith.constant 0 : index
      %c0_11 = arith.constant 0 : index
      %12 = vector.load %arg6[%c0_10, %c0_11] : memref<8x128xf32, #tpu.memory_space<vmem>>, vector<8x128xf32>
      tpu.vector_store %arg6[%c0_10, %c0_11], %11 {strides = array<i32>} : memref<8x128xf32, #tpu.memory_space<vmem>>, vector<8x128xf32>,
    } else {
    }
    %c0 = arith.constant 0 : index
    %c0_1 = arith.constant 0 : index
    %3 = vector.load %arg6[%c0, %c0_1] : memref<8x128xf32, #tpu.memory_space<vmem>>, vector<8x128xf32>
    %c0_2 = arith.constant 0 : index
    %c0_3 = arith.constant 0 : index
    %4 = vector.load %arg3[%c0_2, %c0_3] : memref<8x128xf32, #tpu.memory_space<vmem>>, vector<8x128xf32>
    %c0_4 = arith.constant 0 : index
    %c0_5 = arith.constant 0 : index
    %5 = vector.load %arg4[%c0_4, %c0_5] : memref<128x128xf32, #tpu.memory_space<vmem>>, vector<128x128xf32>
    %cst = arith.constant dense<0.000000e+00> : vector<8x128xf32>
    %6 = tpu.matmul %4, %5, %cst {dimension_numbers = #tpu.dot_dimension_numbers<[1], [0], [0], [1], [0, 0, 1, 1], [], []>} : vector<8x128xf32>, vector<128x128xf32>, vector<8x128xf32> -> vector<8x128xf32>
    %7 = arith.addf %3, %6 : vector<8x128xf32>
    %c0_6 = arith.constant 0 : index
    %c0_7 = arith.constant 0 : index
    %8 = vector.load %arg6[%c0_6, %c0_7] : memref<8x128xf32, #tpu.memory_space<vmem>>, vector<8x128xf32>
    tpu.vector_store %arg6[%c0_6, %c0_7], %7 {strides = array<i32>} : memref<8x128xf32, #tpu.memory_space<vmem>>, vector<8x128xf32>,
    return
  }
  func.func @transform_0(%arg0: i32, %arg1: i32, %arg2: i32) -> (i32, i32) {
    %c0_i32 = arith.constant 0 : i32
    return %arg0, %arg2 : i32, i32
  }
  func.func @transform_1(%arg0: i32, %arg1: i32, %arg2: i32) -> (i32, i32) {
    %c0_i32 = arith.constant 0 : i32
    return %arg2, %arg1 : i32, i32
  }
  func.func @transform_2(%arg0: i32, %arg1: i32, %arg2: i32) -> (i32, i32) {
    %c0_i32 = arith.constant 0 : i32
    %c0_i32_0 = arith.constant 0 : i32
    return %c0_i32, %arg1 : i32, i32
  }
  func.func @transform_3(%arg0: i32, %arg1: i32, %arg2: i32) -> (i32, i32) {
    %c0_i32 = arith.constant 0 : i32
    return %arg0, %arg1 : i32, i32
  }
}

</mosaic_0001>

<bundles_post_ra>
// kernel: tpu_custom_call.1
= control target key start
LH: loop header
LB: loop body
LE: loop exit
PB: predicated region body
PF: predicated region fallthrough
CT: control target
= control target key end

     0   :  { %8 = vsyncpa [#allocation3], 0  ;;  %s324_s0 = inlined_call_operand.hbm [shape: f32[8,128], index: 0, kind: input, shape index: {}]   ;;  %s325_s1 = inlined_call_operand.hbm [shape: f32[128,128], index: 1, kind: input, shape index: {}]   ;;  %s326_s2 = inlined_call_operand.vmem [shape: f32[1,128], index: 2, kind: input, shape index: {}]   ;;  %s327_s3 = inlined_call_operand.hbm [shape: f32[8,128], index: 3, kind: output, shape index: {}]  }
   0x1   :  { %9 = vsyncpa [#allocation6], 0 }
   0x2   :  { %10 = vsyncpa [#allocation4], 0  ;;  %s285_s12 = smov [#allocation2]   ;;  %s286_s14 = smov [#allocation5]  }
   0x3   :  { %s17_s13 = sshll.u32 %s285_s12, 4  ;;  %s26_s15 = sshll.u32 %s286_s14, 4  ;;  %s18_s13 = int_to_ptr.vmem [resolvable:$true] %s17_s13  ;;  %s27_s15 = int_to_ptr.vmem [resolvable:$true] %s26_s15 }
   0x4   :  { %s227_s16 = scalar_lea.vmem %s18_s13, 128  ;;  %p232_p1 = scmp.lt.s32.totalorder %s18_s13, %s18_s13 }
   0x5   :  { %p228_p0 = scmp.ne.s32.totalorder %s18_s13, %s227_s16  ;;  %p233_p2 = scmp.lt.s32.totalorder %s227_s16, %s227_s16 }
   0x7   :  { %p234_p3 = por %p233_p2, %p232_p1 }
   0x9   :  { %p235_p4 = pnand %p234_p3, %p228_p0 }
   0xb   :  { %238 = shalt.err (!%p235_p4)
}
   0xc   :  { %20 = dma.hbm_to_vmem [thread:$0]  %s324_s0, 128, %s18_s13, [#allocation3]  }
   0xd   :  { %s247_s19 = scalar_lea.vmem %s27_s15, 2048  ;;  %p252_p6 = scmp.lt.s32.totalorder %s27_s15, %s27_s15 }
   0xe   :  { %p248_p5 = scmp.ne.s32.totalorder %s27_s15, %s247_s19  ;;  %p253_p7 = scmp.lt.s32.totalorder %s247_s19, %s247_s19 }
  0x10   :  { %p254_p8 = por %p253_p7, %p252_p6 }
  0x12   :  { %p255_p9 = pnand %p254_p8, %p248_p5 }
  0x14   :  { %258 = shalt.err (!%p255_p9)
}
  0x15   :  { %s287_s20 = smov 128   ;;  %s288_s21 = smov 8  }
  0x16   :  { %32 = dma.hbm_to_vmem [thread:$0]  %s325_s1, 2048, %s27_s15, [#allocation6], %s287_s20, %s287_s20, %s288_s21  }
  0x17   :  { %279 = dma.done.wait [#allocation3], 128  }
  0x18   :  { %280 = vsyncadd [#allocation3], 4294967168 }
  0x19   :  { %281 = dma.done.wait [#allocation6], 2048  }
  0x1a   :  { %282 = vsyncadd [#allocation6], 4294965248  ;;  %v289_v0 = vmov 0.0   ;;  %vm290_vm0 = vmmov 0   ;;  %v70_v1 = vld [vmem:[#allocation5 + $0x78] sm:$0xff]  ;;  %v69_v2 = vld [vmem:[#allocation5 + $0x70] sm:$0xff] }
  0x1b   :  { %177 = vmatprep.subr.mxu0 %v289_v0  ;;  %209 = vmatprep.mubr.msk.f32.mxu0 %vm290_vm0, %v289_v0  ;;  %v68_v3 = vld [vmem:[#allocation5 + $0x68] sm:$0xff]  ;;  %v67_v4 = vld [vmem:[#allocation5 + $0x60] sm:$0xff]  ;;  %v66_v5 = vld [vmem:[#allocation5 + $0x58] sm:$0xff]  ;;  %s291_s24 = smov [#allocation7]  }
  0x1c   :  { %178 = vmatpush3.msra.mxu0 %v70_v1  ;;  %v65_v6 = vld [vmem:[#allocation5 + $0x50] sm:$0xff]  ;;  %v64_v7 = vld [vmem:[#allocation5 + $0x48] sm:$0xff]  ;;  %v63_v8 = vld [vmem:[#allocation5 + $0x40] sm:$0xff]  ;;  %s149_s25 = sshll.u32 %s291_s24, 4  ;;  %s150_s25 = int_to_ptr.vmem [resolvable:$true] %s149_s25 }
  0x1d   :  { %179 = vmatprep.subr.mxu0 %v289_v0  ;;  %v62_v9 = vld [vmem:[#allocation5 + $0x38] sm:$0xff]  ;;  %v61_v10 = vld [vmem:[#allocation5 + $0x30] sm:$0xff]  ;;  %v60_v11 = vld [vmem:[#allocation5 + $0x28] sm:$0xff]  ;;  %s259_s26 = scalar_lea.vmem %s150_s25, 128  ;;  %p264_p11 = scmp.lt.s32.totalorder %s150_s25, %s150_s25 }
  0x1e   :  { %180 = vmatpush3.msra.mxu0 %v69_v2  ;;  %v59_v12 = vld [vmem:[#allocation5 + $0x20] sm:$0xff]  ;;  %v58_v13 = vld [vmem:[#allocation5 + $0x18] sm:$0xff]  ;;  %v57_v14 = vld [vmem:[#allocation5 + $0x10] sm:$0xff]  ;;  %p260_p10 = scmp.ne.s32.totalorder %s150_s25, %s259_s26  ;;  %p265_p12 = scmp.lt.s32.totalorder %s259_s26, %s259_s26 }
  0x1f   :  { %181 = vmatprep.subr.mxu0 %v289_v0  ;;  %v56_v15 = vld [vmem:[#allocation5 + $0x8] sm:$0xff]  ;;  %v55_v16 = vld [vmem:[#allocation5] sm:$0xff]  ;;  %v54_v17 = vld [vmem:[#allocation2] sm:$0xff] }
  0x20   :  { %182 = vmatpush3.msra.mxu0 %v68_v3  ;;  %v159_v18 = vld [vmem:[%s326_s2] ss:$0 sm:$0xff]  ;;  %p266_p13 = por %p265_p12, %p264_p11 }
  0x21   :  { %183 = vmatprep.subr.mxu0 %v289_v0 }
  0x22   :  { %184 = vmatpush3.msra.mxu0 %v67_v4  ;;  %p267_p0 = pnand %p266_p13, %p260_p10 }
  0x23   :  { %185 = vmatprep.subr.mxu0 %v289_v0 }
  0x24   :  { %186 = vmatpush3.msra.mxu0 %v66_v5 }
  0x25   :  { %187 = vmatprep.subr.mxu0 %v289_v0 }
  0x26   :  { %188 = vmatpush3.msra.mxu0 %v65_v6 }
  0x27   :  { %189 = vmatprep.subr.mxu0 %v289_v0 }
  0x28   :  { %190 = vmatpush3.msra.mxu0 %v64_v7 }
  0x29   :  { %191 = vmatprep.subr.mxu0 %v289_v0 }
  0x2a   :  { %192 = vmatpush3.msra.mxu0 %v63_v8 }
  0x2b   :  { %193 = vmatprep.subr.mxu0 %v289_v0 }
  0x2c   :  { %194 = vmatpush3.msra.mxu0 %v62_v9 }
  0x2d   :  { %195 = vmatprep.subr.mxu0 %v289_v0 }
  0x2e   :  { %196 = vmatpush3.msra.mxu0 %v61_v10 }
  0x2f   :  { %197 = vmatprep.subr.mxu0 %v289_v0 }
  0x30   :  { %198 = vmatpush3.msra.mxu0 %v60_v11 }
  0x31   :  { %199 = vmatprep.subr.mxu0 %v289_v0 }
  0x32   :  { %200 = vmatpush3.msra.mxu0 %v59_v12 }
  0x33   :  { %201 = vmatprep.subr.mxu0 %v289_v0 }
  0x34   :  { %202 = vmatpush3.msra.mxu0 %v58_v13 }
  0x35   :  { %203 = vmatprep.subr.mxu0 %v289_v0 }
  0x36   :  { %204 = vmatpush3.msra.mxu0 %v57_v14 }
  0x37   :  { %205 = vmatprep.subr.mxu0 %v289_v0 }
  0x38   :  { %206 = vmatpush3.msra.mxu0 %v56_v15 }
  0x39   :  { %207 = vmatprep.subr.mxu0 %v289_v0 }
  0x3a   :  { %208 = vmatpush3.msra.mxu0 %v55_v16 }
  0x3b   :  { %210 = vmatmul.mubr.f32.vlgmr.msra.gmra.mxu0 %v54_v17 }
  0xfb   :  { %v137_v19 = vpop.f32.mrf.mxu0 }
  0xfc   :  { %v141_v20 = vadd.f32 %v159_v18, %v137_v19 }
  0xfd   :  { %v211_v21 = vpop.f32.mrf.mxu0 }
  0xfe   :  { %142 = vst [vmem:[#allocation7] sm:$0xff] %v141_v20 }
  0xff   :  { %270 = shalt.err (!%p267_p0)
}
 0x100   :  { %152 = dma.vmem_to_hbm [thread:$0]  %s150_s25, 128, %s327_s3, [#allocation4]  }
 0x101   :  { %283 = dma.done.wait [#allocation4], 128  }
 0x102   :  { %284 = vsyncadd [#allocation4], 4294967168 }
 0x103   :  { %156 = vsyncpa [#allocation3], 1 }
 0x104   :  { %157 = vsyncpa [#allocation6], 1 }
 0x105   :  { %158 = vsyncpa [#allocation4], 1 }

</bundles_post_ra>
